<compile_context>
chip_gen: v6e
topology: v6e:2x2x1
jax: 0.10.0
libtpu: 0.0.40
codegen_flags: <defaults>
</compile_context>

<pallas_src>
import functools
import math

import jax
import jax.numpy as jnp
from jax import lax
from jax.experimental import pallas as pl
from jax.experimental.pallas import tpu as pltpu

# Finite "-inf": exp() underflows to exactly 0, with no NaN risk in the online max.
_MASK_VALUE = -1e30


def _round_up(x, m):
    return (x + m - 1) // m * m


def _flash_causal_attention_kernel(xq_ref, xkv_ref, wqkv_ref, o_ref,
                                   q_scr, m_scr, l_scr, acc_scr,
                                   *, sm_scale, d_head):
    qi = pl.program_id(1)            # query-block index        (parallel)
    ki = pl.program_id(2)            # key/value-block index    (reduction, last)
    nk = pl.num_programs(2)

    # ---- init per query block: reset online-softmax state, project + scale Q ----
    @pl.when(ki == 0)
    def _init():
        m_scr[...] = jnp.full(m_scr.shape, _MASK_VALUE, dtype=m_scr.dtype)
        l_scr[...] = jnp.zeros_like(l_scr)
        acc_scr[...] = jnp.zeros_like(acc_scr)
        q = jnp.dot(xq_ref[...], wqkv_ref[:, :d_head],
                    preferred_element_type=jnp.float32)          # (TQ, d_head)
        q_scr[...] = q * sm_scale     # fold 1/sqrt(d_out) into Q (O(T*d), not O(T*T))

    # ---- skip above-diagonal KV tiles entirely: they are fully masked ----
    @pl.when(ki <= qi)
    def _visible():
        # Fused K|V projection: one MXU pass against the [Wk | Wv] half of the slab.
        kv = jnp.dot(xkv_ref[...], wqkv_ref[:, d_head:],
                     preferred_element_type=jnp.float32)          # (TK, 2*d_head)
        k = kv[:, :d_head]
        v = kv[:, d_head:]

        # Scores for this (TQ, TK) tile; Q already carries the 1/sqrt(d_out) scale.
        s = lax.dot_general(q_scr[...], k, (((1,), (1,)), ((), ())),
                            preferred_element_type=jnp.float32)

        def online_update(s):
            m_prev = m_scr[...]
            m_new = jnp.maximum(m_prev, jnp.max(s, axis=-1, keepdims=True))
            alpha = jnp.exp(m_prev - m_new)
            p = jnp.exp(s - m_new)
            l_scr[...] = alpha * l_scr[...] + jnp.sum(p, axis=-1, keepdims=True)
            acc_scr[...] = alpha * acc_scr[...] + jnp.dot(
                p, v, preferred_element_type=jnp.float32)
            m_scr[...] = m_new

        @pl.when(ki < qi)    # strictly-below-diagonal tile: fully visible, no mask
        def _():
            online_update(s)

        @pl.when(ki == qi)   # diagonal tile: causal mask (local == global indices
        def _():             # here because TQ == TK)
            tq, tk = s.shape
            row = lax.broadcasted_iota(jnp.int32, (tq, tk), 0)
            col = lax.broadcasted_iota(jnp.int32, (tq, tk), 1)
            online_update(jnp.where(col > row, _MASK_VALUE, s))

    # TODO(synk): nn.Dropout on the attention weights — the module is evaluated with
    # eval/p=0.0 semantics, so dropout is the identity here.

    # ---- finalize on the last KV step: normalize, emit lane-dense output slab ----
    @pl.when(ki == nk - 1)
    def _finalize():
        inv_l = pl.reciprocal(l_scr[...], approx=True)   # EUP slot; VALU stays free
        o_ref[...] = (acc_scr[...] * inv_l).astype(o_ref.dtype)


def causal_attention(x, w_query, w_key, w_value, *, block_t=128):
    """x: (B, T, d_in); w_*: PyTorch nn.Linear weights of shape (d_out, d_in)."""
    B, T, d_in = x.shape
    d_out, d_in_w = w_query.shape
    assert d_in_w == d_in
    assert block_t % 8 == 0

    sm_scale = 1.0 / math.sqrt(d_out)       # keys.shape[-1] ** 0.5 in PyTorch
    d_head = _round_up(d_out, 128)          # lane-dense padded head dim

    blk = min(block_t, _round_up(T, 8))     # TQ == TK (required by the diag logic)
    t_pad = _round_up(T, blk)
    num_t = t_pad // blk

    # Right-pad the sequence; padded key columns are automatically removed by the
    # causal mask (their index exceeds every valid query index), and padded query
    # rows are sliced off below.
    x_p = x if t_pad == T else jnp.pad(x, ((0, 0), (0, t_pad - T), (0, 0)))

    # Fused, transposed, zero-padded [Wq | Wk | Wv] slab: (d_in, 3 * d_head).
    def pad_w(w):
        return jnp.pad(w.T, ((0, 0), (0, d_head - d_out)))
    wqkv = jnp.concatenate([pad_w(w_query), pad_w(w_key), pad_w(w_value)], axis=1)

    kernel = functools.partial(_flash_causal_attention_kernel,
                               sm_scale=sm_scale, d_head=d_head)

    out_p = pl.pallas_call(
        kernel,
        out_shape=jax.ShapeDtypeStruct((B, t_pad, d_head), x.dtype),
        grid_spec=pltpu.PrefetchScalarGridSpec(
            num_scalar_prefetch=0,
            grid=(B, num_t, num_t),
            in_specs=[
                # query-side x tile (leading batch dim squeezed out of the ref);
                # its index map ignores ki, so it is not re-DMA'd per KV step.
                pl.BlockSpec((None, blk, d_in), lambda b, qi, ki: (b, qi, 0)),
                # key/value-side x tile
                pl.BlockSpec((None, blk, d_in), lambda b, qi, ki: (b, ki, 0)),
                # fused weight slab, constant across the grid
                pl.BlockSpec((d_in, 3 * d_head), lambda b, qi, ki: (0, 0)),
            ],
            out_specs=pl.BlockSpec((None, blk, d_head),
                                   lambda b, qi, ki: (b, qi, 0)),
            scratch_shapes=[
                pltpu.VMEM((blk, d_head), jnp.float32),   # q (pre-scaled)
                pltpu.VMEM((blk, 1), jnp.float32),        # m: running row max
                pltpu.VMEM((blk, 1), jnp.float32),        # l: running denominator
                pltpu.VMEM((blk, d_head), jnp.float32),   # acc: unnormalized output
            ],
        ),
        compiler_params=pltpu.CompilerParams(
            dimension_semantics=("parallel", "parallel", "arbitrary"),
            vmem_limit_bytes=48 * 1024 * 1024,   # headroom under v7x's 64 MiB VMEM
        ),
    )(x_p, x_p, wqkv)

    return out_p[:, :T, :d_out]


def reference_causal_attention(x, w_query, w_key, w_value):
    """Pure-JAX reference mirroring the PyTorch forward."""
    q = jnp.einsum("btd,od->bto", x, w_query)
    k = jnp.einsum("btd,od->bto", x, w_key)
    v = jnp.einsum("btd,od->bto", x, w_value)
    scores = jnp.einsum("bqo,bko->bqk", q, k)
    T = x.shape[1]
    mask = jnp.triu(jnp.ones((T, T), dtype=bool), k=1)
    scores = jnp.where(mask[None], -jnp.inf, scores)
    attn = jax.nn.softmax(scores / math.sqrt(k.shape[-1]), axis=-1)
    return jnp.einsum("bqk,bko->bqo", attn, v)


def _check(out, ref, atol=2e-2, rtol=2e-2):
    # Tolerance note: the flash restructuring (scale folded into Q, deferred
    # normalization, per-block accumulation, approximate reciprocal) changes where
    # rounding happens relative to the naive reference; agreement is expected at
    # the ~1e-3 level, while structural bugs show up as O(1).
    assert out.shape == ref.shape, (out.shape, ref.shape)
    assert bool(jnp.all(jnp.isfinite(out)))
    err = float(jnp.max(jnp.abs(out - ref)))
    tol = atol + rtol * float(jnp.max(jnp.abs(ref)))
    assert err <= tol, f"max abs err {err} > tol {tol}"


if __name__ == "__main__":
    key = jax.random.PRNGKey(0)
    kq, kk, kv, kx2, kq2, kk2, kv2 = jax.random.split(key, 7)

    # ---- Test 1: the exact configuration of the PyTorch script -------------
    d_in, d_out = 3, 2
    inputs = jnp.array(
        [[0.43, 0.15, 0.89],
         [0.55, 0.87, 0.66],
         [0.57, 0.85, 0.64],
         [0.22, 0.58, 0.33],
         [0.77, 0.25, 0.10],
         [0.05, 0.80, 0.55]], dtype=jnp.float32)
    x = jnp.stack((inputs, inputs), axis=0)          # (2, 6, 3)

    bound = 1.0 / math.sqrt(d_in)                    # nn.Linear init, qkv_bias=False
    w_query = jax.random.uniform(kq, (d_out, d_in), jnp.float32, -bound, bound)
    w_key = jax.random.uniform(kk, (d_out, d_in), jnp.float32, -bound, bound)
    w_value = jax.random.uniform(kv, (d_out, d_in), jnp.float32, -bound, bound)

    out = jax.block_until_ready(causal_attention(x, w_query, w_key, w_value))
    ref = reference_causal_attention(x, w_query, w_key, w_value)
    assert out.shape == (2, 6, 2)
    _check(out, ref)

    # ---- Test 2: multi-block flash path (off-diagonal tiles, block skipping,
    #              sequence + d_out padding), still small -------------------
    B2, T2, d_in2, d_out2 = 2, 40, 16, 32
    x2 = jax.random.normal(kx2, (B2, T2, d_in2), jnp.float32)
    bound2 = 1.0 / math.sqrt(d_in2)
    w_q2 = jax.random.uniform(kq2, (d_out2, d_in2), jnp.float32, -bound2, bound2)
    w_k2 = jax.random.uniform(kk2, (d_out2, d_in2), jnp.float32, -bound2, bound2)
    w_v2 = jax.random.uniform(kv2, (d_out2, d_in2), jnp.float32, -bound2, bound2)

    out2 = jax.block_until_ready(
        causal_attention(x2, w_q2, w_k2, w_v2, block_t=16))
    ref2 = reference_causal_attention(x2, w_q2, w_k2, w_v2)
    assert out2.shape == (B2, T2, d_out2)
    _check(out2, ref2)

    print("KERNEL_OK")
</pallas_src>

<mosaic_0001>
module attributes {stable_mosaic.version = 11 : i64} {
  func.func @_flash_causal_attention_kernel(%arg0: i32, %arg1: i32, %arg2: i32, %arg3: memref<1x8x3xf32, #tpu.memory_space<vmem>>, %arg4: memref<1x8x3xf32, #tpu.memory_space<vmem>>, %arg5: memref<3x384xf32, #tpu.memory_space<vmem>>, %arg6: memref<1x8x128xf32, #tpu.memory_space<vmem>>, %arg7: memref<8x128xf32, #tpu.memory_space<vmem>>, %arg8: memref<8x1xf32, #tpu.memory_space<vmem>>, %arg9: memref<8x1xf32, #tpu.memory_space<vmem>>, %arg10: memref<8x128xf32, #tpu.memory_space<vmem>>) attributes {dimension_semantics = [#tpu.dimension_semantics<parallel>, #tpu.dimension_semantics<parallel>, #tpu.dimension_semantics<arbitrary>], iteration_bounds = array<i64: 2, 1, 1>, scalar_prefetch = 0 : i64, scratch_operands = 4 : i64, tpu.core_type = #tpu.core_type<tc>, window_params = [{transform_indices = @transform_0, window_bounds = array<i64: 1, 8, 3>}, {transform_indices = @transform_1, window_bounds = array<i64: 1, 8, 3>}, {pipeline_mode = #tpu.pipeline_mode<synchronous>, transform_indices = @transform_2, window_bounds = array<i64: 3, 384>}, {transform_indices = @transform_3, window_bounds = array<i64: 1, 8, 128>}]} {
    %c0_i32 = arith.constant 0 : i32
    %0 = arith.cmpi eq, %arg2, %c0_i32 : i32
    %1 = arith.extui %0 : i1 to i32
    %c0_i32_0 = arith.constant 0 : i32
    %2 = arith.cmpi ne, %1, %c0_i32_0 : i32
    scf.if %2 {
      %cst = arith.constant -1.000000e+30 : f32
      %9 = vector.broadcast %cst : f32 to vector<8x1xf32>
      %c0 = arith.constant 0 : index
      %c0_4 = arith.constant 0 : index
      %10 = vector.load %arg8[%c0, %c0_4] : memref<8x1xf32, #tpu.memory_space<vmem>>, vector<8x1xf32>
      tpu.vector_store %arg8[%c0, %c0_4], %9 {strides = array<i32>} : memref<8x1xf32, #tpu.memory_space<vmem>>, vector<8x1xf32>,
      %cst_5 = arith.constant 0.000000e+00 : f32
      %11 = vector.broadcast %cst_5 : f32 to vector<8x1xf32>
      %c0_6 = arith.constant 0 : index
      %c0_7 = arith.constant 0 : index
      %12 = vector.load %arg9[%c0_6, %c0_7] : memref<8x1xf32, #tpu.memory_space<vmem>>, vector<8x1xf32>
      tpu.vector_store %arg9[%c0_6, %c0_7], %11 {strides = array<i32>} : memref<8x1xf32, #tpu.memory_space<vmem>>, vector<8x1xf32>,
      %cst_8 = arith.constant 0.000000e+00 : f32
      %13 = vector.broadcast %cst_8 : f32 to vector<8x128xf32>
      %c0_9 = arith.constant 0 : index
      %c0_10 = arith.constant 0 : index
      %14 = vector.load %arg10[%c0_9, %c0_10] : memref<8x128xf32, #tpu.memory_space<vmem>>, vector<8x128xf32>
      tpu.vector_store %arg10[%c0_9, %c0_10], %13 {strides = array<i32>} : memref<8x128xf32, #tpu.memory_space<vmem>>, vector<8x128xf32>,
      %c0_11 = arith.constant 0 : index
      %c0_12 = arith.constant 0 : index
      %c0_13 = arith.constant 0 : index
      %15 = vector.load %arg3[%c0_11, %c0_12, %c0_13] : memref<1x8x3xf32, #tpu.memory_space<vmem>>, vector<1x8x3xf32>
      %16 = vector.shape_cast %15 : vector<1x8x3xf32> to vector<8x3xf32>
      %c0_14 = arith.constant 0 : index
      %c0_15 = arith.constant 0 : index
      %17 = vector.load %arg5[%c0_14, %c0_15] : memref<3x384xf32, #tpu.memory_space<vmem>>, vector<3x128xf32>
      %cst_16 = arith.constant dense<0.000000e+00> : vector<8x128xf32>
      %18 = tpu.matmul %16, %17, %cst_16 {dimension_numbers = #tpu.dot_dimension_numbers<[1], [0], [0], [1], [0, 0, 1, 1], [], []>} : vector<8x3xf32>, vector<3x128xf32>, vector<8x128xf32> -> vector<8x128xf32>
      %cst_17 = arith.constant 0.707106769 : f32
      %19 = vector.broadcast %cst_17 : f32 to vector<8x128xf32>
      %20 = arith.mulf %18, %19 : vector<8x128xf32>
      %c0_18 = arith.constant 0 : index
      %c0_19 = arith.constant 0 : index
      %21 = vector.load %arg7[%c0_18, %c0_19] : memref<8x128xf32, #tpu.memory_space<vmem>>, vector<8x128xf32>
      tpu.vector_store %arg7[%c0_18, %c0_19], %20 {strides = array<i32>} : memref<8x128xf32, #tpu.memory_space<vmem>>, vector<8x128xf32>,
    } else {
    }
    %3 = arith.cmpi sle, %arg2, %arg1 : i32
    %4 = arith.extui %3 : i1 to i32
    %c0_i32_1 = arith.constant 0 : i32
    %5 = arith.cmpi ne, %4, %c0_i32_1 : i32
    scf.if %5 {
      %c0 = arith.constant 0 : index
      %c0_4 = arith.constant 0 : index
      %c0_5 = arith.constant 0 : index
      %9 = vector.load %arg4[%c0, %c0_4, %c0_5] : memref<1x8x3xf32, #tpu.memory_space<vmem>>, vector<1x8x3xf32>
      %10 = vector.shape_cast %9 : vector<1x8x3xf32> to vector<8x3xf32>
      %c0_6 = arith.constant 0 : index
      %c128 = arith.constant 128 : index
      %11 = vector.load %arg5[%c0_6, %c128] : memref<3x384xf32, #tpu.memory_space<vmem>>, vector<3x256xf32>
      %cst = arith.constant dense<0.000000e+00> : vector<8x256xf32>
      %12 = tpu.matmul %10, %11, %cst {dimension_numbers = #tpu.dot_dimension_numbers<[1], [0], [0], [1], [0, 0, 1, 1], [], []>} : vector<8x3xf32>, vector<3x256xf32>, vector<8x256xf32> -> vector<8x256xf32>
      %13 = vector.extract_strided_slice %12 {offsets = [0, 0], sizes = [8, 128], strides = [1, 1]} : vector<8x256xf32> to vector<8x128xf32>
      %14 = vector.extract_strided_slice %12 {offsets = [0, 128], sizes = [8, 128], strides = [1, 1]} : vector<8x256xf32> to vector<8x128xf32>
      %c0_7 = arith.constant 0 : index
      %c0_8 = arith.constant 0 : index
      %15 = vector.load %arg7[%c0_7, %c0_8] : memref<8x128xf32, #tpu.memory_space<vmem>>, vector<8x128xf32>
      %cst_9 = arith.constant dense<0.000000e+00> : vector<8x8xf32>
      %16 = tpu.matmul %15, %13, %cst_9 {dimension_numbers = #tpu.dot_dimension_numbers<[1], [1], [0], [0], [0, 0, 1, 0], [], []>} : vector<8x128xf32>, vector<8x128xf32>, vector<8x8xf32> -> vector<8x8xf32>
      %17 = arith.cmpi slt, %arg2, %arg1 : i32
      %18 = arith.extui %17 : i1 to i32
      %c0_i32_10 = arith.constant 0 : i32
      %19 = arith.cmpi ne, %18, %c0_i32_10 : i32
      scf.if %19 {
        %c0_12 = arith.constant 0 : index
        %c0_13 = arith.constant 0 : index
        %23 = vector.load %arg8[%c0_12, %c0_13] : memref<8x1xf32, #tpu.memory_space<vmem>>, vector<8x1xf32>
        %cst_14 = arith.constant dense<0xFF800000> : vector<8xf32>
        %24 = vector.multi_reduction <maximumf>, %16, %cst_14 [1] : vector<8x8xf32> to vector<8xf32>
        %25 = vector.shape_cast %24 : vector<8xf32> to vector<8x1xf32>
        %26 = arith.maximumf %23, %25 : vector<8x1xf32>
        %27 = arith.subf %23, %26 : vector<8x1xf32>
        %28 = math.exp %27 : vector<8x1xf32>
        %29 = vector.broadcast %26 : vector<8x1xf32> to vector<8x8xf32>
        %30 = arith.subf %16, %29 : vector<8x8xf32>
        %31 = math.exp %30 : vector<8x8xf32>
        %c0_15 = arith.constant 0 : index
        %c0_16 = arith.constant 0 : index
        %32 = vector.load %arg9[%c0_15, %c0_16] : memref<8x1xf32, #tpu.memory_space<vmem>>, vector<8x1xf32>
        %33 = arith.mulf %28, %32 : vector<8x1xf32>
        %cst_17 = arith.constant dense<0.000000e+00> : vector<8xf32>
        %34 = vector.multi_reduction <add>, %31, %cst_17 [1] : vector<8x8xf32> to vector<8xf32>
        %35 = vector.shape_cast %34 : vector<8xf32> to vector<8x1xf32>
        %36 = arith.addf %33, %35 : vector<8x1xf32>
        %c0_18 = arith.constant 0 : index
        %c0_19 = arith.constant 0 : index
        %37 = vector.load %arg9[%c0_18, %c0_19] : memref<8x1xf32, #tpu.memory_space<vmem>>, vector<8x1xf32>
        tpu.vector_store %arg9[%c0_18, %c0_19], %36 {strides = array<i32>} : memref<8x1xf32, #tpu.memory_space<vmem>>, vector<8x1xf32>,
        %c0_20 = arith.constant 0 : index
        %c0_21 = arith.constant 0 : index
        %38 = vector.load %arg10[%c0_20, %c0_21] : memref<8x128xf32, #tpu.memory_space<vmem>>, vector<8x128xf32>
        %39 = vector.broadcast %28 : vector<8x1xf32> to vector<8x128xf32>
        %40 = arith.mulf %39, %38 : vector<8x128xf32>
        %cst_22 = arith.constant dense<0.000000e+00> : vector<8x128xf32>
        %41 = tpu.matmul %31, %14, %cst_22 {dimension_numbers = #tpu.dot_dimension_numbers<[1], [0], [0], [1], [0, 0, 1, 1], [], []>} : vector<8x8xf32>, vector<8x128xf32>, vector<8x128xf32> -> vector<8x128xf32>
        %42 = arith.addf %40, %41 : vector<8x128xf32>
        %c0_23 = arith.constant 0 : index
        %c0_24 = arith.constant 0 : index
        %43 = vector.load %arg10[%c0_23, %c0_24] : memref<8x128xf32, #tpu.memory_space<vmem>>, vector<8x128xf32>
        tpu.vector_store %arg10[%c0_23, %c0_24], %42 {strides = array<i32>} : memref<8x128xf32, #tpu.memory_space<vmem>>, vector<8x128xf32>,
        %c0_25 = arith.constant 0 : index
        %c0_26 = arith.constant 0 : index
        %44 = vector.load %arg8[%c0_25, %c0_26] : memref<8x1xf32, #tpu.memory_space<vmem>>, vector<8x1xf32>
        tpu.vector_store %arg8[%c0_25, %c0_26], %26 {strides = array<i32>} : memref<8x1xf32, #tpu.memory_space<vmem>>, vector<8x1xf32>,
      } else {
      }
      %20 = arith.cmpi eq, %arg2, %arg1 : i32
      %21 = arith.extui %20 : i1 to i32
      %c0_i32_11 = arith.constant 0 : i32
      %22 = arith.cmpi ne, %21, %c0_i32_11 : i32
      scf.if %22 {
        %23 = tpu.iota {dimensions = array<i32: 0>} : vector<8x8xi32>
        %24 = tpu.iota {dimensions = array<i32: 1>} : vector<8x8xi32>
        %25 = arith.cmpi sgt, %24, %23 : vector<8x8xi32>
        %cst_12 = arith.constant -1.000000e+30 : f32
        %26 = vector.broadcast %cst_12 : f32 to vector<8x8xf32>
        %27 = arith.select %25, %26, %16 : vector<8x8xi1>, vector<8x8xf32>
        %c0_13 = arith.constant 0 : index
        %c0_14 = arith.constant 0 : index
        %28 = vector.load %arg8[%c0_13, %c0_14] : memref<8x1xf32, #tpu.memory_space<vmem>>, vector<8x1xf32>
        %cst_15 = arith.constant dense<0xFF800000> : vector<8xf32>
        %29 = vector.multi_reduction <maximumf>, %27, %cst_15 [1] : vector<8x8xf32> to vector<8xf32>
        %30 = vector.shape_cast %29 : vector<8xf32> to vector<8x1xf32>
        %31 = arith.maximumf %28, %30 : vector<8x1xf32>
        %32 = arith.subf %28, %31 : vector<8x1xf32>
        %33 = math.exp %32 : vector<8x1xf32>
        %34 = vector.broadcast %31 : vector<8x1xf32> to vector<8x8xf32>
        %35 = arith.subf %27, %34 : vector<8x8xf32>
        %36 = math.exp %35 : vector<8x8xf32>
        %c0_16 = arith.constant 0 : index
        %c0_17 = arith.constant 0 : index
        %37 = vector.load %arg9[%c0_16, %c0_17] : memref<8x1xf32, #tpu.memory_space<vmem>>, vector<8x1xf32>
        %38 = arith.mulf %33, %37 : vector<8x1xf32>
        %cst_18 = arith.constant dense<0.000000e+00> : vector<8xf32>
        %39 = vector.multi_reduction <add>, %36, %cst_18 [1] : vector<8x8xf32> to vector<8xf32>
        %40 = vector.shape_cast %39 : vector<8xf32> to vector<8x1xf32>
        %41 = arith.addf %38, %40 : vector<8x1xf32>
        %c0_19 = arith.constant 0 : index
        %c0_20 = arith.constant 0 : index
        %42 = vector.load %arg9[%c0_19, %c0_20] : memref<8x1xf32, #tpu.memory_space<vmem>>, vector<8x1xf32>
        tpu.vector_store %arg9[%c0_19, %c0_20], %41 {strides = array<i32>} : memref<8x1xf32, #tpu.memory_space<vmem>>, vector<8x1xf32>,
        %c0_21 = arith.constant 0 : index
        %c0_22 = arith.constant 0 : index
        %43 = vector.load %arg10[%c0_21, %c0_22] : memref<8x128xf32, #tpu.memory_space<vmem>>, vector<8x128xf32>
        %44 = vector.broadcast %33 : vector<8x1xf32> to vector<8x128xf32>
        %45 = arith.mulf %44, %43 : vector<8x128xf32>
        %cst_23 = arith.constant dense<0.000000e+00> : vector<8x128xf32>
        %46 = tpu.matmul %36, %14, %cst_23 {dimension_numbers = #tpu.dot_dimension_numbers<[1], [0], [0], [1], [0, 0, 1, 1], [], []>} : vector<8x8xf32>, vector<8x128xf32>, vector<8x128xf32> -> vector<8x128xf32>
        %47 = arith.addf %45, %46 : vector<8x128xf32>
        %c0_24 = arith.constant 0 : index
        %c0_25 = arith.constant 0 : index
        %48 = vector.load %arg10[%c0_24, %c0_25] : memref<8x128xf32, #tpu.memory_space<vmem>>, vector<8x128xf32>
        tpu.vector_store %arg10[%c0_24, %c0_25], %47 {strides = array<i32>} : memref<8x128xf32, #tpu.memory_space<vmem>>, vector<8x128xf32>,
        %c0_26 = arith.constant 0 : index
        %c0_27 = arith.constant 0 : index
        %49 = vector.load %arg8[%c0_26, %c0_27] : memref<8x1xf32, #tpu.memory_space<vmem>>, vector<8x1xf32>
        tpu.vector_store %arg8[%c0_26, %c0_27], %31 {strides = array<i32>} : memref<8x1xf32, #tpu.memory_space<vmem>>, vector<8x1xf32>,
      } else {
      }
    } else {
    }
    %c0_i32_2 = arith.constant 0 : i32
    %6 = arith.cmpi eq, %arg2, %c0_i32_2 : i32
    %7 = arith.extui %6 : i1 to i32
    %c0_i32_3 = arith.constant 0 : i32
    %8 = arith.cmpi ne, %7, %c0_i32_3 : i32
    scf.if %8 {
      %c0 = arith.constant 0 : index
      %c0_4 = arith.constant 0 : index
      %9 = vector.load %arg9[%c0, %c0_4] : memref<8x1xf32, #tpu.memory_space<vmem>>, vector<8x1xf32>
      %10 = tpu.reciprocal %9 {approx = true} : vector<8x1xf32> -> vector<8x1xf32>
      %c0_5 = arith.constant 0 : index
      %c0_6 = arith.constant 0 : index
      %11 = vector.load %arg10[%c0_5, %c0_6] : memref<8x128xf32, #tpu.memory_space<vmem>>, vector<8x128xf32>
      %12 = vector.broadcast %10 : vector<8x1xf32> to vector<8x128xf32>
      %13 = arith.mulf %11, %12 : vector<8x128xf32>
      %c0_7 = arith.constant 0 : index
      %c0_8 = arith.constant 0 : index
      %c0_9 = arith.constant 0 : index
      %14 = vector.load %arg6[%c0_7, %c0_8, %c0_9] : memref<1x8x128xf32, #tpu.memory_space<vmem>>, vector<1x8x128xf32>
      %15 = vector.shape_cast %14 : vector<1x8x128xf32> to vector<8x128xf32>
      %16 = vector.shape_cast %13 : vector<8x128xf32> to vector<1x8x128xf32>
      tpu.vector_store %arg6[%c0_7, %c0_8, %c0_9], %16 {strides = array<i32>} : memref<1x8x128xf32, #tpu.memory_space<vmem>>, vector<1x8x128xf32>,
    } else {
    }
    return
  }
  func.func @transform_0(%arg0: i32, %arg1: i32, %arg2: i32) -> (i32, i32, i32) {
    %c0_i32 = arith.constant 0 : i32
    %c0_i32_0 = arith.constant 0 : i32
    return %arg0, %arg1, %c0_i32 : i32, i32, i32
  }
  func.func @transform_1(%arg0: i32, %arg1: i32, %arg2: i32) -> (i32, i32, i32) {
    %c0_i32 = arith.constant 0 : i32
    %c0_i32_0 = arith.constant 0 : i32
    return %arg0, %arg2, %c0_i32 : i32, i32, i32
  }
  func.func @transform_2(%arg0: i32, %arg1: i32, %arg2: i32) -> (i32, i32) {
    %c0_i32 = arith.constant 0 : i32
    %c0_i32_0 = arith.constant 0 : i32
    %c0_i32_1 = arith.constant 0 : i32
    return %c0_i32, %c0_i32_0 : i32, i32
  }
  func.func @transform_3(%arg0: i32, %arg1: i32, %arg2: i32) -> (i32, i32, i32) {
    %c0_i32 = arith.constant 0 : i32
    %c0_i32_0 = arith.constant 0 : i32
    return %arg0, %arg1, %c0_i32 : i32, i32, i32
  }
}

</mosaic_0001>

<bundles_post_ra>
// kernel: tpu_custom_call.1
= control target key start
LH: loop header
LB: loop body
LE: loop exit
PB: predicated region body
PF: predicated region fallthrough
CT: control target
= control target key end

     0   :  { %8 = vsyncpa [#allocation7], 0  ;;  %s1151_s0 = inlined_call_operand.vmem [shape: f32[2,8,3], index: 0, kind: input, shape index: {}]   ;;  %s1152_s1 = inlined_call_operand.vmem [shape: f32[2,8,3], index: 1, kind: input, shape index: {}]   ;;  %s1153_s2 = inlined_call_operand.vmem [shape: f32[3,384], index: 2, kind: input, shape index: {}]   ;;  %s1154_s3 = inlined_call_operand.hbm [shape: f32[2,8,128], index: 3, kind: output, shape index: {}]  }
   0x1   :  { %10 = vsyncpa [#allocation7 + $0x1], 0  ;;  %s1033_s12 = smov 0   ;;  %s1035_s13 = smov 0  }
   0x2   :  { %s1037_s14 = smov 0   ;;  %s1039_s15 = smov 0  }
   0x3   :  { %s1041_s16 = smov 0   ;;  %s1043_s17 = smov 0  }
   0x4 LB: > { %s822_s18 = sadd.s32 4294967295, %s1006_s17   ;;  %s823_s19 = sadd.s32 4294967294, %s1006_s17   ;;  %s1006_s17 = sphi %s1043_s17, %s16_s17   ;;  %s1002_s16 = sphi %s1041_s16, %s1161_s16   ;;  %s998_s15 = sphi %s1039_s15, %s1160_s15   ;;  %s994_s14 = sphi %s1037_s14, %s1159_s14   ;;  %s990_s13 = sphi %s1035_s13, %s1158_s13   ;;  %s986_s12 = sphi %s1033_s12, %s1157_s12  }
   0x5   : > { %s35_s20 = sadd.s32 1, %s1002_s16  ;;  %s121_s21 = sadd.s32 1, %s994_s14 }
   0x6   : > { %p37_p0 = scmp.ge.s32.totalorder %s35_s20, 2  ;;  %p131_p1 = scmp.ne.s32.totalorder %s994_s14, %s990_s13 }
   0x7   : > { %p132_p2 = scmp.eq.s32.totalorder %s822_s18, 1  ;;  %p137_p3 = scmp.ne.s32.totalorder %s990_s13, %s986_s12 }
   0x8   : > { %s1163_s20 = smov (%p37_p0, %s35_s20), 0  ;;  %p138_p5 = scmp.eq.s32.totalorder %s823_s19, 1 }
   0x9   : > { %p1073_p4 = por %p132_p2, %p131_p1  ;;  %s116_s23 = ssub.s32 %s1002_s16, %s1163_s20 }
   0xa   : > { %p826_p6 = scmp.ge.s32.totalorder %s1006_s17, 1  ;;  %p119_p7 = scmp.eq.s32.totalorder %s116_s23, 0 }
   0xb   : > { %p1080_p8 = por %p138_p5, %p137_p3  ;;  %p179_p9 = scmp.lt.s32.totalorder %s1006_s17, 3 }
   0xc   : > { %s1086_s25 = scalar_select %p119_p7, %s994_s14, %s121_s21  }
   0xd   : > { %p180_p10 = pnand %p826_p6, %p179_p9 }
   0xe   : > { %p212_p11 = scmp.lt.s32.totalorder (!%p180_p10), %s998_s15, 1  ;;  %s209_s11 = sand.u32 (!%p180_p10), 1, %s990_s13  }
   0xf   : > { %183 = sbr.rel (%p180_p10) target bundleno = 1002 (0x3ea), region = 32  ;;  %s827_s18 = sshll.u32 (!%p180_p10), %s209_s11, 3 }
  0x10   : > { %s838_s19 = sshll.u32 (!%p180_p10), %s998_s15, 7  ;;  %s211_s21 = scalar_lea.vmem (!%p180_p10), [#allocation6], %s827_s18 }
  0x11   : > { %s733_s23 = sshll.u32 (!%p180_p10), %s211_s21, 4  ;;  %s731_s28 = scalar_lea.hbm (!%p180_p10), %s1154_s3, %s838_s19  ;;  %s734_s23 = int_to_ptr.vmem [resolvable:$true] %s733_s23 }
  0x12   : > { %s719_s29 = scalar_lea.sflag (!%p180_p10), [#allocation7], %s209_s11 }
  0x14   : > { %vm240_vm0 = vcmask 1042432   ;;  %v321_v0 = vld [vmem:[%s1153_s2 + $0x4] sm:$0x77]  ;;  %v235_v1 = vld [vmem:[%s1153_s2] sm:$0x7]  ;;  %v1008_v2 = vmov 0.0   ;;  %v591_v12 = vlaneseq }
  0x15   : > { %847 = vmatprep.subr.mxu0 %v1008_v2  ;;  %v323_v3 = vcombine.high %v321_v0, %v321_v0  ;;  %397 = vmatprep.mubr.f32.mxu1 %v1008_v2  ;;  %vm1009_vm1 = vmmov 0   ;;  %s213_s30 = scalar_select %p212_p11, %s998_s15, 1  ;;  %vm236_vm2 = vcmask 23552   ;;  %vm230_vm3 = vcmask 7168  }
  0x16   : > { %848 = vmatpush3.msk.msra.mxu0 %vm240_vm0, %v235_v1  ;;  %849 = vmatprep.mubr.msk.f32.mxu0 %vm1009_vm1, %v1008_v2  ;;  %v1010_v11 = vmov -1e+30   ;;  %232 = vst.msk [vmem:[#allocation4] sm:$0xff] %vm230_vm3, %v1008_v2  ;;  %v592_v13 = vshrl.u32 %v591_v12, 7  ;;  %v594_v14 = vand.u32 127, %v591_v12  ;;  %vm598_vm5 = vcmask 64512  }
  0x17   : > { %832 = vmatprep.subr.msk.mxu1 %vm240_vm0, %v323_v3  ;;  %852 = vmatprep.subr.mxu0 %v1008_v2  ;;  %s828_s4 = sshll.u32 %s213_s30, 3  ;;  %231 = vst.msk [vmem:[#allocation3] sm:$0xff] %vm230_vm3, %v1010_v11  ;;  %v1011_v19 = vmov 0   ;;  %s930_s30 = scalar_lea.vmem %s734_s23, 128 }
  0x18   : > { %833 = vmatpush1.msk.msra.mxu1 %vm240_vm0, %v321_v0  ;;  %s218_s7 = scalar_lea.vmem %s1151_s0, %s828_s4  ;;  %s225_s10 = scalar_lea.vmem %s1152_s1, %s828_s4  ;;  %vm595_vm4 = vcmp.gt.s32.totalorder %v594_v14, %v592_v13  ;;  %921 = vset.pattern.permute.xlu0 %v1011_v19 }
  0x19   : > { %857 = vmatprep.subr.mxu1 %v1008_v2  ;;  %v234_v4 = vld [vmem:[%s218_s7] sm:$0xff]  ;;  %922 = vset.pattern.permute.xlu1 %v1011_v19  ;;  %p931_p12 = scmp.ne.s32.totalorder %s734_s23, %s930_s30  ;;  %s1012_s4 = smov [#allocation6]  }
  0x1a   : > { %v320_v5 = vld [vmem:[%s225_s10] sm:$0xff]  ;;  %850 = vmatmul.mubr.msk.f32.vlgmr.msra.gmra.mxu0 %vm236_vm2, %v234_v4  ;;  %s934_s5 = sshll.u32 %s1012_s4, 4  ;;  %s935_s5 = int_to_ptr.vmem [resolvable:$false] %s934_s5 }
  0x1b   : > { %834 = vmatmul.mubr.msk.f32.vlgmr.msra.gmra.mxu1 %vm236_vm2, %v320_v5  ;;  %854 = vmatprep.mubr.msk.f32.mxu0 %vm1009_vm1, %v1008_v2  ;;  %p932_p13 = pnand %p931_p12, %p1073_p4  ;;  %s936_s15 = scalar_lea.vmem %s935_s5, 256 }
  0x1c   : > { %859 = vmatprep.mubr.msk.f32.mxu1 %vm1009_vm1, %v1008_v2  ;;  %p937_p1 = scmp.lt.s32.totalorder %s734_s23, %s935_s5  ;;  %p938_p2 = scmp.lt.s32.totalorder %s936_s15, %s930_s30 }
  0x1d   : > { %v614_v31 = vld [vmem:[#allocation4] sm:$0xff]  ;;  %p933_p0 = pneg %p932_p13 }
  0x1e   : > { %v597_v20 = vld [vmem:[#allocation3] sm:$0xff]  ;;  %p939_p3 = por %p938_p2, %p937_p1 }
  0x20   : > { %p940_p5 = pnand %p939_p3, %p933_p0 }
  0xda   : > { %v310_v6 = vpop.f32.mrf.mxu0 }
  0xdb   : > { %v399_v7 = vpop.f32.mrf.mxu1  ;;  %v314_v8 = vmul.f32 0.70710677, %v310_v6 }
  0xdc   : > { %853 = vmatpush3.xpose.msra.mxu0 %v399_v7  ;;  %v851_v9 = vpop.f32.mrf.mxu0 }
  0xdd   : > { %v401_v10 = vpop.f32.mrf.mxu1 }
  0xde   : > { %858 = vmatpush3.msra.mxu1 %v401_v10 }
  0xdf   : > { %855 = vmatmul.mubr.f32.vlgmr.msra.gmra.mxu0 %v314_v8 }
 0x19f   : > { %v471_v15 = vpop.f32.mrf.mxu0 }
 0x1a0   : > { %v596_v16 = vsel %vm595_vm4, -1e+30, %v471_v15 }
 0x1a1   : > { %v856_v17 = vpop.f32.mrf.mxu0  ;;  %v599_v18 = vsel %vm598_vm5, %v596_v16, -inf }
 0x1a2   : > { %600 = vmax.xlane.f32.xlu0 %v599_v18 }
 0x22b   : > { %v601_v21 = vpop.xlane.xlu0 %600 }
 0x22c   : > { %v602_v22 = vmax.f32 %v597_v20, %v601_v21 }
 0x22e   : > { %v603_v23 = vsub.f32 %v597_v20, %v602_v22  ;;  %704 = vst.msk [vmem:[#allocation3] sm:$0xff] %vm230_vm3, %v602_v22  ;;  %608 = vperm.xlu0 %921, %v602_v22  }
 0x230   : > { %v604_v28 = vmul.f32 1.442695, %v603_v23 }
 0x2a9   : > { %v609_v24 = vpop.permute.xlu0 %608 }
 0x2aa   : > { %v611_v25 = vsub.f32 %v596_v16, %v609_v24 }
 0x2ac   : > { %v612_v26 = vmul.f32 1.442695, %v611_v25 }
 0x2ae   : > { %924 = vpow2.f32 %v612_v26 }
 0x2af   : > { %926 = vpow2.f32 %v604_v28 }
 0x2bb   : > { %v925_v27 = vpop.eup %924 }
 0x2bc   : > { %860 = vmatmul.mubr.msk.f32.vlgmr.msra.gmra.mxu1 %vm598_vm5, %v925_v27  ;;  %v616_v29 = vsel %vm598_vm5, %v925_v27, 0.0  ;;  %v927_v30 = vpop.eup %926 }
 0x2bd   : > { %617 = vadd.xlane.f32.xlu1 %v616_v29  ;;  %v615_v32 = vmul.f32 %v927_v30, %v614_v31 }
 0x2ce   : > { %625 = vperm.xlu1 %922, %v927_v30  }
 0x346   : > { %v618_v33 = vpop.xlane.xlu1 %617 }
 0x347   : > { %v619_v34 = vadd.f32 %v618_v33, %v615_v32 }
 0x349   : > { %621 = vst.msk [vmem:[#allocation4] sm:$0xff] %vm230_vm3, %v619_v34 }
 0x34a   : > { %v626_v39 = vpop.permute.xlu1 %625 }
 0x34b   : > { %v628_v40 = vmul.f32 0.0, %v626_v39 }
 0x350   : > { %v708_v35 = vld [vmem:[#allocation4] sm:$0xff] }
 0x351   : > { %928 = vrcp.f32 %v708_v35 }
 0x35e   : > { %v929_v36 = vpop.eup %928 }
 0x35f   : > { %713 = vperm.xlu1 %922, %v929_v36  }
 0x37c   : > { %v698_v37 = vpop.f32.mrf.mxu1 }
 0x37d   : > { %v702_v41 = vadd.f32 %v698_v37, %v628_v40 }
 0x37e   : > { %v861_v38 = vpop.f32.mrf.mxu1 }
 0x3da   : > { %v714_v42 = vpop.permute.xlu1 %713 }
 0x3db   : > { %v716_v43 = vmul.f32 %v714_v42, %v702_v41 }
 0x3dd   : > { %717 = vst [vmem:[%s211_s21] sm:$0xff] %v716_v43 }
 0x3de   : > { %943 = shalt.err (!%p940_p5)
}
 0x3df   : > { %s944_s6 = scalar_lea.hbm %s731_s28, 128  ;;  %s948_s9 = scalar_lea.hbm %s1154_s3, 256 }
 0x3e0   : > { %p945_p6 = scmp.ne.s32.totalorder %s731_s28, %s944_s6  ;;  %p949_p10 = scmp.lt.s32.totalorder %s731_s28, %s1154_s3 }
 0x3e1   : > { %p950_p11 = scmp.lt.s32.totalorder %s948_s9, %s944_s6 }
 0x3e2   : > { %p946_p7 = pnand %p945_p6, %p1073_p4 }
 0x3e3   : > { %p951_p12 = por %p950_p11, %p949_p10 }
 0x3e4   : > { %p947_p9 = pneg %p946_p7 }
 0x3e6   : > { %p952_p13 = pnand %p951_p12, %p947_p9 }
 0x3e8   : > { %955 = shalt.err (!%p952_p13)
}
 0x3e9   : > { %862 = dma.vmem_to_hbm [thread:$0]  (%p1073_p4), %s734_s23, 128, %s731_s28, %s719_s29  }
 0x3ea PF: > { %p868_p0 = scmp.ge.s32.totalorder %s1006_s17, 2  ;;  %s745_s18 = sand.u32 1, %s986_s12  }
 0x3eb   : > { %s746_s19 = scalar_lea.sflag [#allocation7], %s745_s18 }
 0x3ec   : > { %p865_p1 = pnand %p868_p0, %p1080_p8 }
 0x3ee   : > { %p866_p2 = pneg %p865_p1 }
 0x3f0   : > { %981 = dma.done.wait (%p866_p2), %s746_s19, 128  }
 0x3f1   : > { %983 = vsyncadd (%p866_p2), %s746_s19, 4294967168  ;;  %s16_s17 = sadd.s32 1, %s1006_s17   ;;  %s1157_s12 = smov %s990_s13 }
 0x3f2   : > { %p13_p3 = scmp.ge.s32.totalorder %s16_s17, 4   ;;  %s1158_s13 = smov %s994_s14 }
 0x3f3   : > { %s1159_s14 = smov %s1086_s25  ;;  %s1160_s15 = smov %s1002_s16 }
 0x3f4   : > { %s1161_s16 = smov %s1163_s20  ;;  %15 = sbr.rel (!%p13_p3) target bundleno = 4 (0x4), region = 90 }
 0x3f9   :  { %751 = vsyncpa [#allocation7], 1 }
 0x3fa   :  { %753 = vsyncpa [#allocation7 + $0x1], 1 }

</bundles_post_ra>
